<compile_context>
chip_gen: v5e
topology: v5e:2x2
jax: 0.10.0
libtpu: 0.0.40
codegen_flags: <defaults>
</compile_context>

<pallas_src>
import functools

import jax
import jax.numpy as jnp
from jax import lax
from jax.experimental import pallas as pl
from jax.experimental.pallas import tpu as pltpu


# ----------------------- Kernel 1: BN batch statistics -----------------------

def bn_stats_kernel(x_ref, sum_ref, sq_ref):
    """Per-row sum / sum-of-squares, accumulated over lane tiles.

    x_ref: (N*C, tl) tile of the (N*C, H*W) activation view.
    sum_ref / sq_ref: (N*C, 1) accumulators (same output block every step).
    """
    @pl.when(pl.program_id(0) == 0)
    def _init():
        sum_ref[...] = jnp.zeros_like(sum_ref)
        sq_ref[...] = jnp.zeros_like(sq_ref)

    x = x_ref[...]
    sum_ref[...] += jnp.sum(x, axis=1, keepdims=True)
    sq_ref[...] += jnp.sum(x * x, axis=1, keepdims=True)


# ------------- Kernel 2: fused BN-normalize + sign() + conv (stride 1) -------

def bin_conv_kernel(x_ref, scale_ref, shift_ref, w_ref, b_ref, o_ref, acc_ref,
                    *, ksize, padding, height, width, margin):
    """One batch sample x one OC tile.

    x_ref:     (1, C, H*W) f32 raw activations.
    scale_ref: (C, 1) f32   BN folded scale  (gamma * rsqrt(var+eps)).
    shift_ref: (C, 1) f32   BN folded shift  (beta - mean*scale).
    w_ref:     (K*K, toc, C) bf16 weight taps.
    b_ref:     (toc, 1) f32 conv bias.
    o_ref:     (1, toc, H*W) f32 output (lane-dense).
    acc_ref:   (toc, H*W + 2*margin) f32 scratch accumulator.
    """
    L = height * width
    C = x_ref.shape[1]

    # Zero the oversized accumulator; [margin, margin+L) is the real output,
    # the slop on both sides absorbs taps that fall off the top/bottom rows.
    acc_ref[...] = jnp.zeros_like(acc_ref)

    # BN normalize (f32, VPU) + sign() -> {-1, 0, +1}.
    x = x_ref[0]                                          # (C, L)
    xn = x * scale_ref[...] + shift_ref[...]
    xq = jnp.where(xn > 0.0, 1.0, jnp.where(xn < 0.0, -1.0, 0.0))  # f32

    # Column index of each flat spatial position (for column-validity masks).
    col = lax.broadcasted_iota(jnp.int32, (C, L), 1) % width

    # Conv as K*K shifted matmuls: tap (dy, dx) contributes
    #   out[:, l] += W[:, :, dy, dx] @ xq[:, l + (dy-p)*W + (dx-p)]
    # which we realize by accumulating the (toc, L) product into the scratch
    # at a static offset.  Row overflow lands in the slop; column wrap-around
    # is masked out before the matmul.
    for dx in range(ksize):
        ox = dx - padding
        if ox > 0:
            xm = jnp.where(col >= ox, xq, 0.0)
        elif ox < 0:
            xm = jnp.where(col < width + ox, xq, 0.0)
        else:
            xm = xq
        xm = xm.astype(jnp.bfloat16)                      # exact: {-1, 0, +1}
        for dy in range(ksize):
            oy = dy - padding
            w_tap = w_ref[dy * ksize + dx]                # (toc, C) bf16
            p_tap = jnp.dot(w_tap, xm, preferred_element_type=jnp.float32)
            start = margin - (oy * width + ox)            # static slice
            acc_ref[:, start:start + L] += p_tap

    # Finalize: bias + lane-dense store.
    out = acc_ref[:, margin:margin + L] + b_ref[...]
    o_ref[...] = out[None].astype(o_ref.dtype)


# ------------------------------ Host wrapper ---------------------------------

def bin_conv2d(x_nchw, gamma, beta, conv_w, conv_b, *, kernel_size, stride, padding):
    """BinConv2d forward: BatchNorm2d(batch stats) -> sign() -> Conv2d."""
    N, C, H, W = x_nchw.shape
    OC = conv_w.shape[0]
    K = kernel_size
    OH = (H + 2 * padding - K) // stride + 1
    OW = (W + 2 * padding - K) // stride + 1
    if stride != 1 or OH != H or OW != W:
        # TODO(synk): generalize the fused kernel to strided / non-"same"
        # convs (the 1x1 stride-2 downsample path of _make_layer); only the
        # stride-1 "same" binary convs used on the ResNet main path are fused.
        raise NotImplementedError("fused BinConv2d kernel supports stride-1 'same' convs")

    L = H * W
    NC = N * C
    x_rows = x_nchw.reshape(NC, L)            # free reshape, no transpose

    # ---- Kernel 1: tiled sum / sumsq reduction for BN batch statistics ----
    tl = 128 if L % 128 == 0 else L
    row_sum, row_sq = pl.pallas_call(
        bn_stats_kernel,
        out_shape=(jax.ShapeDtypeStruct((NC, 1), jnp.float32),
                   jax.ShapeDtypeStruct((NC, 1), jnp.float32)),
        grid=(L // tl,),
        in_specs=[pl.BlockSpec((NC, tl), lambda k: (0, k))],
        out_specs=(pl.BlockSpec((NC, 1), lambda k: (0, 0)),
                   pl.BlockSpec((NC, 1), lambda k: (0, 0))),
        compiler_params=pltpu.CompilerParams(
            dimension_semantics=("arbitrary",),
            vmem_limit_bytes=32 * 1024 * 1024),
        cost_estimate=pl.CostEstimate(
            flops=3 * NC * L, transcendentals=0,
            bytes_accessed=4 * NC * L + 8 * NC),
    )(x_rows)

    # Tiny (C,)-sized epilogue: fold BN into a per-channel scale & shift.
    cnt = jnp.float32(N * H * W)
    ch_sum = row_sum.reshape(N, C).sum(axis=0)
    ch_sq = row_sq.reshape(N, C).sum(axis=0)
    mean = ch_sum / cnt
    var = jnp.maximum(ch_sq / cnt - mean * mean, 0.0)      # biased variance
    inv = lax.rsqrt(var + 1e-4)                            # eps = 1e-4
    scale = (gamma * inv).astype(jnp.float32)
    shift = (beta - mean * gamma * inv).astype(jnp.float32)

    # ---- Kernel 2: fused normalize + sign + conv ----
    # Weights -> (K*K, OC, C) bf16 taps; bias -> (OC, 1) f32.
    w_taps = jnp.transpose(conv_w.reshape(OC, C, K * K), (2, 0, 1)).astype(jnp.bfloat16)
    b_col = conv_b.reshape(OC, 1).astype(jnp.float32)

    toc = OC if OC <= 256 else 256
    assert OC % toc == 0
    margin = max(padding, K - 1 - padding) * (W + 1)

    kernel = functools.partial(bin_conv_kernel, ksize=K, padding=padding,
                               height=H, width=W, margin=margin)

    out = pl.pallas_call(
        kernel,
        out_shape=jax.ShapeDtypeStruct((N, OC, L), jnp.float32),
        grid=(N, OC // toc),
        in_specs=[
            pl.BlockSpec((1, C, L), lambda n, j: (n, 0, 0)),        # activations
            pl.BlockSpec((C, 1), lambda n, j: (0, 0)),              # BN scale
            pl.BlockSpec((C, 1), lambda n, j: (0, 0)),              # BN shift
            pl.BlockSpec((K * K, toc, C), lambda n, j: (0, j, 0)),  # weight taps
            pl.BlockSpec((toc, 1), lambda n, j: (j, 0)),            # bias
        ],
        out_specs=pl.BlockSpec((1, toc, L), lambda n, j: (n, j, 0)),
        scratch_shapes=[pltpu.VMEM((toc, L + 2 * margin), jnp.float32)],
        compiler_params=pltpu.CompilerParams(
            dimension_semantics=("parallel", "parallel"),
            vmem_limit_bytes=32 * 1024 * 1024),
        cost_estimate=pl.CostEstimate(
            flops=2 * N * OC * C * K * K * L + 6 * N * C * L,
            transcendentals=0,
            bytes_accessed=4 * N * C * L + 4 * N * OC * L + 2 * K * K * OC * C),
    )(x_nchw.reshape(N, C, L), scale.reshape(C, 1), shift.reshape(C, 1),
      w_taps, b_col)

    return out.reshape(N, OC, OH, OW)        # free reshape: already NCHW order


# ------------------------------ Reference (pure JAX) --------------------------

def bin_conv2d_ref(x, gamma, beta, conv_w, conv_b, *, kernel_size, stride, padding):
    mean = jnp.mean(x, axis=(0, 2, 3), keepdims=True)
    var = jnp.mean((x - mean) ** 2, axis=(0, 2, 3), keepdims=True)
    xn = (x - mean) * lax.rsqrt(var + 1e-4) * gamma.reshape(1, -1, 1, 1) \
        + beta.reshape(1, -1, 1, 1)
    xb = jnp.sign(xn)
    out = lax.conv_general_dilated(
        xb, conv_w, window_strides=(stride, stride),
        padding=[(padding, padding), (padding, padding)],
        dimension_numbers=("NCHW", "OIHW", "NCHW"),
        precision=lax.Precision.HIGHEST)
    return out + conv_b.reshape(1, -1, 1, 1)


# ----------------------------------- Main -------------------------------------

if __name__ == "__main__":
    key = jax.random.PRNGKey(0)
    k_x, k_w, k_b, k_g, k_be = jax.random.split(key, 5)

    # BinConv2d hyperparameters (3x3 stride-1 "same", the ResNet main path).
    input_channels, output_channels = 4, 8
    kernel_size, stride, padding = 3, 1, 1

    N, H, W = 2, 16, 16
    x = jax.random.normal(k_x, (N, input_channels, H, W), dtype=jnp.float32)

    conv_w = 0.1 * jax.random.normal(
        k_w, (output_channels, input_channels, kernel_size, kernel_size),
        dtype=jnp.float32)
    # Make the test weights exactly representable in bf16 so the bf16-MXU
    # kernel and the f32 reference agree tightly (binarized activations
    # {-1, 0, +1} are already bf16-exact).
    conv_w = conv_w.astype(jnp.bfloat16).astype(jnp.float32)
    conv_b = 0.05 * jax.random.normal(k_b, (output_channels,), dtype=jnp.float32)
    gamma = 1.0 + 0.1 * jax.random.normal(k_g, (input_channels,), dtype=jnp.float32)
    beta = 0.1 * jax.random.normal(k_be, (input_channels,), dtype=jnp.float32)

    out = bin_conv2d(x, gamma, beta, conv_w, conv_b,
                     kernel_size=kernel_size, stride=stride, padding=padding)
    out = jax.block_until_ready(out)

    ref = bin_conv2d_ref(x, gamma, beta, conv_w, conv_b,
                         kernel_size=kernel_size, stride=stride, padding=padding)
    assert out.shape == (N, output_channels, H, W), out.shape
    err = float(jnp.max(jnp.abs(out - ref)))
    assert jnp.allclose(out, ref, atol=2e-4, rtol=2e-4), err

    # TODO(synk): the ResNet top-level graph (conv1/bn1/relu, the 31 unrolled
    # residual stages, resconv1/2, avgpool, fc, bn32/33, logsoftmax) is not
    # instantiable from the given __init__ (it defines no layers); only the
    # BinConv2d building block is implemented here.
    print("KERNEL_OK")
</pallas_src>

<mosaic_0001>
module attributes {stable_mosaic.version = 11 : i64} {
  func.func @bn_stats_kernel(%arg0: i32, %arg1: memref<8x128xf32, #tpu.memory_space<vmem>>, %arg2: memref<8x1xf32, #tpu.memory_space<vmem>>, %arg3: memref<8x1xf32, #tpu.memory_space<vmem>>) attributes {dimension_semantics = [#tpu.dimension_semantics<arbitrary>], iteration_bounds = array<i64: 2>, scalar_prefetch = 0 : i64, scratch_operands = 0 : i64, tpu.core_type = #tpu.core_type<tc>, window_params = [{transform_indices = @transform_0, window_bounds = array<i64: 8, 128>}, {pipeline_mode = #tpu.pipeline_mode<synchronous>, transform_indices = @transform_1, window_bounds = array<i64: 8, 1>}, {pipeline_mode = #tpu.pipeline_mode<synchronous>, transform_indices = @transform_2, window_bounds = array<i64: 8, 1>}]} {
    %c0_i32 = arith.constant 0 : i32
    %0 = arith.cmpi eq, %arg0, %c0_i32 : i32
    %1 = arith.extui %0 : i1 to i32
    %c0_i32_0 = arith.constant 0 : i32
    %2 = arith.cmpi ne, %1, %c0_i32_0 : i32
    scf.if %2 {
      %cst_11 = arith.constant 0.000000e+00 : f32
      %15 = vector.broadcast %cst_11 : f32 to vector<8x1xf32>
      %c0_12 = arith.constant 0 : index
      %c0_13 = arith.constant 0 : index
      %16 = vector.load %arg2[%c0_12, %c0_13] : memref<8x1xf32, #tpu.memory_space<vmem>>, vector<8x1xf32>
      tpu.vector_store %arg2[%c0_12, %c0_13], %15 {strides = array<i32>} : memref<8x1xf32, #tpu.memory_space<vmem>>, vector<8x1xf32>,
      %cst_14 = arith.constant 0.000000e+00 : f32
      %17 = vector.broadcast %cst_14 : f32 to vector<8x1xf32>
      %c0_15 = arith.constant 0 : index
      %c0_16 = arith.constant 0 : index
      %18 = vector.load %arg3[%c0_15, %c0_16] : memref<8x1xf32, #tpu.memory_space<vmem>>, vector<8x1xf32>
      tpu.vector_store %arg3[%c0_15, %c0_16], %17 {strides = array<i32>} : memref<8x1xf32, #tpu.memory_space<vmem>>, vector<8x1xf32>,
    } else {
    }
    %c0 = arith.constant 0 : index
    %c0_1 = arith.constant 0 : index
    %3 = vector.load %arg1[%c0, %c0_1] : memref<8x128xf32, #tpu.memory_space<vmem>>, vector<8x128xf32>
    %c0_2 = arith.constant 0 : index
    %c0_3 = arith.constant 0 : index
    %4 = vector.load %arg2[%c0_2, %c0_3] : memref<8x1xf32, #tpu.memory_space<vmem>>, vector<8x1xf32>
    %cst = arith.constant dense<0.000000e+00> : vector<8xf32>
    %5 = vector.multi_reduction <add>, %3, %cst [1] : vector<8x128xf32> to vector<8xf32>
    %6 = vector.shape_cast %5 : vector<8xf32> to vector<8x1xf32>
    %7 = arith.addf %4, %6 : vector<8x1xf32>
    %c0_4 = arith.constant 0 : index
    %c0_5 = arith.constant 0 : index
    %8 = vector.load %arg2[%c0_4, %c0_5] : memref<8x1xf32, #tpu.memory_space<vmem>>, vector<8x1xf32>
    tpu.vector_store %arg2[%c0_4, %c0_5], %7 {strides = array<i32>} : memref<8x1xf32, #tpu.memory_space<vmem>>, vector<8x1xf32>,
    %c0_6 = arith.constant 0 : index
    %c0_7 = arith.constant 0 : index
    %9 = vector.load %arg3[%c0_6, %c0_7] : memref<8x1xf32, #tpu.memory_space<vmem>>, vector<8x1xf32>
    %10 = arith.mulf %3, %3 : vector<8x128xf32>
    %cst_8 = arith.constant dense<0.000000e+00> : vector<8xf32>
    %11 = vector.multi_reduction <add>, %10, %cst_8 [1] : vector<8x128xf32> to vector<8xf32>
    %12 = vector.shape_cast %11 : vector<8xf32> to vector<8x1xf32>
    %13 = arith.addf %9, %12 : vector<8x1xf32>
    %c0_9 = arith.constant 0 : index
    %c0_10 = arith.constant 0 : index
    %14 = vector.load %arg3[%c0_9, %c0_10] : memref<8x1xf32, #tpu.memory_space<vmem>>, vector<8x1xf32>
    tpu.vector_store %arg3[%c0_9, %c0_10], %13 {strides = array<i32>} : memref<8x1xf32, #tpu.memory_space<vmem>>, vector<8x1xf32>,
    return
  }
  func.func @transform_0(%arg0: i32) -> (i32, i32) {
    %c0_i32 = arith.constant 0 : i32
    %c0_i32_0 = arith.constant 0 : i32
    return %c0_i32, %arg0 : i32, i32
  }
  func.func @transform_1(%arg0: i32) -> (i32, i32) {
    %c0_i32 = arith.constant 0 : i32
    %c0_i32_0 = arith.constant 0 : i32
    %c0_i32_1 = arith.constant 0 : i32
    return %c0_i32, %c0_i32_0 : i32, i32
  }
  func.func @transform_2(%arg0: i32) -> (i32, i32) {
    %c0_i32 = arith.constant 0 : i32
    %c0_i32_0 = arith.constant 0 : i32
    %c0_i32_1 = arith.constant 0 : i32
    return %c0_i32, %c0_i32_0 : i32, i32
  }
}

</mosaic_0001>

<bundles_post_ra>
// kernel: tpu_custom_call.1
= control target key start
LH: loop header
LB: loop body
LE: loop exit
PB: predicated region body
PF: predicated region fallthrough
CT: control target
= control target key end

     0   :  { %8 = vsyncpa [#allocation3], 0  ;;  %s451_s0 = inlined_call_operand.hbm [shape: f32[8,256], index: 0, kind: input, shape index: {}]   ;;  %s452_s1 = inlined_call_operand.vmem [shape: f32[8,1], index: 1, kind: output, shape index: {0}]   ;;  %s453_s2 = inlined_call_operand.vmem [shape: f32[8,1], index: 2, kind: output, shape index: {1}]  }
   0x1   :  { %10 = vsyncpa [#allocation3 + $0x1], 0  ;;  %s343_s9 = smov 0   ;;  %s345_s10 = smov 0  }
   0x2   :  { %s347_s11 = smov 0   ;;  %s349_s12 = smov 0  }
   0x3 LB: > { %s211_s13 = sadd.s32 4294967295, %s325_s12   ;;  %s363_s14 = sadd.s32 1, %s325_s12   ;;  %s325_s12 = sphi %s349_s12, %s460_s12   ;;  %s321_s11 = sphi %s347_s11, %s459_s11   ;;  %s317_s10 = sphi %s345_s10, %s458_s10   ;;  %s313_s9 = sphi %s343_s9, %s457_s9  }
   0x4   : > { %s20_s15 = ssub.s32 %s325_s12, %s363_s14  ;;  %s23_s16 = sadd.s32 1, %s321_s11 }
   0x5   : > { %p21_p0 = scmp.eq.s32.totalorder %s20_s15, 0  ;;  %p30_p1 = scmp.ne.s32.totalorder %s321_s11, %s317_s10 }
   0x6   : > { %p31_p2 = scmp.eq.s32.totalorder %s325_s12, 0  ;;  %p36_p3 = scmp.ne.s32.totalorder %s317_s10, %s313_s9 }
   0x7   : > { %s373_s17 = scalar_select %p21_p0, %s321_s11, %s23_s16  }
   0x8   : > { %p375_p4 = por %p31_p2, %p30_p1  ;;  %p37_p5 = scmp.eq.s32.totalorder %s211_s13, 0 }
   0x9   : > { %p227_p6 = scmp.lt.s32.totalorder %s325_s12, 2  ;;  %s102_s20 = sand.u32 1, %s321_s11  }
   0xa   : > { %p382_p7 = por %p37_p5, %p36_p3  ;;  %s214_s21 = sshll.u32 %s102_s20, 3 }
   0xb   : > { %s215_s22 = sshll.u32 %s325_s12, 3  ;;  %s106_s26 = scalar_lea.vmem [#allocation2], %s214_s21 }
   0xc   : > { %s110_s25 = scalar_lea.hbm %s451_s0, %s215_s22  ;;  %s114_s27 = sshll.u32 %s106_s26, 4  ;;  %s115_s27 = int_to_ptr.vmem [resolvable:$true] %s114_s27 }
   0xd   : > { %s112_s28 = sshll.u32 %s110_s25, 4  ;;  %p393_p8 = pnand %p227_p6, %p375_p4  ;;  %s113_s28 = int_to_ptr.hbm [resolvable:$true] %s112_s28 }
   0xe   : > { %p216_p9 = scmp.ge.s32.totalorder %s325_s12, 1  ;;  %p119_p10 = scmp.lt.s32.totalorder %s325_s12, 3 }
   0xf   : > { %s103_s30 = scalar_lea.sflag [#allocation3], %s102_s20  ;;  %s261_s3 = sshra.s32 %s113_s28, 4  ;;  %s262_s3 = int_to_ptr.hbm [resolvable:$true] %s261_s3 }
  0x10   : > { %s263_s4 = scalar_lea.hbm %s262_s3, 8  ;;  %p265_p12 = pneg %p393_p8 }
  0x11   : > { %p264_p11 = scmp.ne.s32.totalorder %s262_s3, %s263_s4  ;;  %s268_s7 = scalar_lea.hbm %s451_s0, 16 }
  0x12   : > { %p269_p1 = scmp.lt.s32.totalorder %s262_s3, %s451_s0  ;;  %p270_p2 = scmp.lt.s32.totalorder %s268_s7, %s263_s4 }
  0x13   : > { %p266_p13 = pnand %p265_p12, %p264_p11 }
  0x14   : > { %p271_p3 = por %p270_p2, %p269_p1 }
  0x15   : > { %p267_p0 = pneg %p266_p13 }
  0x17   : > { %p272_p4 = pnand %p271_p3, %p267_p0 }
  0x19   : > { %275 = shalt.err (!%p272_p4)
}
  0x1a   : > { %226 = dma.hbm_to_vmem [thread:$0]  (!%p393_p8), %s113_s28, 128, %s115_s27, %s103_s30  }
  0x1b   : > { %p120_p5 = pnand %p216_p9, %p119_p10 }
  0x1c   : > { %s125_s15 = sand.u32 (!%p120_p5), 1, %s317_s10  }
  0x1d   : > { %123 = sbr.rel (%p120_p5) target bundleno = 173 (0xad), region = 24  ;;  %s217_s16 = sshll.u32 (!%p120_p5), %s125_s15, 3 }
  0x1e   : > { %s126_s18 = scalar_lea.sflag (!%p120_p5), [#allocation3], %s125_s15  ;;  %s129_s20 = scalar_lea.vmem (!%p120_p5), [#allocation2], %s217_s16 }
  0x22   : > { %308 = dma.done.wait (%p382_p7), %s126_s18, 128  }
  0x23   : > { %310 = vsyncadd (%p382_p7), %s126_s18, 4294967168  ;;  %p218_p6 = scmp.ne.s32.totalorder %s211_s13, 0 }
  0x25   : > { %149 = sbr.rel (%p218_p6) target bundleno = 45 (0x2d), region = 32 }
  0x2a   : > { %vm150_vm0 = vcmask 7168   ;;  %v327_v0 = vmov 0.0  }
  0x2b   : > { %151 = vst.msk [vmem:[%s452_s1] sm:$0xff] %vm150_vm0, %v327_v0 }
  0x2c   : > { %152 = vst.msk [vmem:[%s453_s2] sm:$0xff] %vm150_vm0, %v327_v0 }
  0x2d PF: > { %v153_v1 = vld [vmem:[%s129_s20] sm:$0xff]  ;;  %vm158_vm1 = vcmask 7168  }
  0x2e   : > { %155 = vadd.xlane.f32.xlu0 %v153_v1  ;;  %v161_v2 = vmul.f32 %v153_v1, %v153_v1 }
  0x32   : > { %v154_v3 = vld [vmem:[%s452_s1] sm:$0xff] }
  0x33   : > { %v160_v6 = vld [vmem:[%s453_s2] sm:$0xff] }
  0x36   : > { %162 = vadd.xlane.f32.xlu0 %v161_v2 }
  0xa1   : > { %v156_v4 = vpop.xlane.xlu0 %155 }
  0xa2   : > { %v157_v5 = vadd.f32 %v156_v4, %v154_v3 }
  0xa4   : > { %159 = vst.msk [vmem:[%s452_s1] sm:$0xff] %vm158_vm1, %v157_v5 }
  0xa9   : > { %v163_v7 = vpop.xlane.xlu0 %162 }
  0xaa   : > { %v164_v8 = vadd.f32 %v163_v7, %v160_v6 }
  0xac   : > { %165 = vst.msk [vmem:[%s453_s2] sm:$0xff] %vm158_vm1, %v164_v8 }
  0xad PF: > { %p13_p7 = scmp.ge.s32.totalorder %s363_s14, 4   ;;  %s457_s9 = smov %s317_s10 }
  0xae   : > { %s458_s10 = smov %s321_s11  ;;  %s459_s11 = smov %s373_s17 }
  0xaf   : > { %s460_s12 = smov %s363_s14  ;;  %15 = sbr.rel (!%p13_p7) target bundleno = 3 (0x3), region = 72 }
  0xb4   :  { %183 = vsyncpa [#allocation3], 1 }
  0xb5   :  { %185 = vsyncpa [#allocation3 + $0x1], 1 }

</bundles_post_ra>
